<compile_context>
chip_gen: v5e
topology: v5e:2x2
jax: 0.10.0
libtpu: 0.0.40
codegen_flags: <defaults>
</compile_context>

<pallas_src>
import functools
import numpy as np
import jax
import jax.numpy as jnp
from jax.experimental import pallas as pl
from jax.experimental.pallas import tpu as pltpu


def _round_up(x: int, m: int) -> int:
    return ((x + m - 1) // m) * m


# ----------------------------------------------------------------------------
# Kernel
# ----------------------------------------------------------------------------
def ddpg_actor_kernel(x_ref, w1_ref, b1_ref, w2_ref, b2_ref, wmu_ref, bmu_ref,
                      out_ref, *, min_max_action):
    # fc1 + ReLU   (bf16 MXU inputs, f32 accumulate, f32 bias/ReLU on the VPU)
    h1 = jnp.dot(x_ref[...], w1_ref[...],
                 preferred_element_type=jnp.float32)
    h1 = jnp.maximum(h1 + b1_ref[...], 0.0)
    # fc2 + ReLU
    h2 = jnp.dot(h1.astype(jnp.bfloat16), w2_ref[...],
                 preferred_element_type=jnp.float32)
    h2 = jnp.maximum(h2 + b2_ref[...], 0.0)
    # mu head: lane-dense padded (bm, 128) output, tanh on EUP, scale on VPU
    mu = jnp.dot(h2.astype(jnp.bfloat16), wmu_ref[...],
                 preferred_element_type=jnp.float32)
    mu = min_max_action * jnp.tanh(mu + bmu_ref[...])
    out_ref[...] = mu.astype(out_ref.dtype)


# ----------------------------------------------------------------------------
# Wrapper
# ----------------------------------------------------------------------------
def ddpg_actor_forward(x, params, *, out_dim, min_max_action=1.0, block_b=256):
    """x: (B, in_dim) f32 -> (B, out_dim) f32."""
    w1, b1, w2, b2, wmu, bmu = params
    B, in_dim = x.shape
    k_pad, h1_pad = w1.shape
    _, h2_pad = w2.shape
    _, out_pad = wmu.shape

    # Batch tile: multiple of 8 sublanes, capped so per-step activations are
    # small (well under the v7x 32 MiB scoped VMEM limit even double-buffered).
    bm = min(block_b, _round_up(B, 8))
    b_pad = _round_up(B, bm)

    # Zero-pad input to the padded (B, K) slab (lane-dense, unmasked loads)
    # and cast to bf16 so the only batch-streaming tensor moves half the bytes.
    x_pad = (jnp.zeros((b_pad, k_pad), jnp.float32)
             .at[:B, :in_dim].set(x).astype(jnp.bfloat16))

    grid = (b_pad // bm,)
    flops = 2 * b_pad * (k_pad * h1_pad + h1_pad * h2_pad + h2_pad * out_pad)
    bytes_accessed = (x_pad.size * 2 + b_pad * out_pad * 4 +
                      (w1.size + w2.size + wmu.size) * 2 +
                      (b1.size + b2.size + bmu.size) * 4)

    out = pl.pallas_call(
        functools.partial(ddpg_actor_kernel, min_max_action=min_max_action),
        out_shape=jax.ShapeDtypeStruct((b_pad, out_pad), jnp.float32),
        grid_spec=pltpu.PrefetchScalarGridSpec(
            num_scalar_prefetch=0,
            grid=grid,
            in_specs=[
                pl.BlockSpec((bm, k_pad), lambda i: (i, 0)),      # x tile streams
                pl.BlockSpec((k_pad, h1_pad), lambda i: (0, 0)),  # weights resident
                pl.BlockSpec((1, h1_pad), lambda i: (0, 0)),
                pl.BlockSpec((h1_pad, h2_pad), lambda i: (0, 0)),
                pl.BlockSpec((1, h2_pad), lambda i: (0, 0)),
                pl.BlockSpec((h2_pad, out_pad), lambda i: (0, 0)),
                pl.BlockSpec((1, out_pad), lambda i: (0, 0)),
            ],
            out_specs=pl.BlockSpec((bm, out_pad), lambda i: (i, 0)),
        ),
        compiler_params=pltpu.CompilerParams(
            dimension_semantics=("parallel",)),
        cost_estimate=pl.CostEstimate(
            flops=flops,
            transcendentals=b_pad * out_pad,
            bytes_accessed=bytes_accessed),
    )(x_pad, w1, b1, w2, b2, wmu, bmu)

    return out[:B, :out_dim]


# ----------------------------------------------------------------------------
# Parameter init mirroring DDPGActorNetwork.__init__ / init_weights
# ----------------------------------------------------------------------------
def make_params(key, input_size, output_size, fc1_dims=400, fc2_dims=300,
                init_w=0.003):
    """fanin_init uses size[0] of the (out, in) weight => 1/sqrt(out_features).
    Biases keep PyTorch nn.Linear default U(-1/sqrt(in_features), +...).
    Weights are returned transposed to (in, out), zero-padded to lane multiples
    and cast to bf16 (f32 accumulation happens in the kernel); biases stay f32.
    """
    k = jax.random.split(key, 6)

    v1 = 1.0 / np.sqrt(fc1_dims)                  # fanin_init((400, in)) -> size[0]
    w1 = jax.random.uniform(k[0], (fc1_dims, input_size), jnp.float32, -v1, v1)
    b1 = jax.random.uniform(k[1], (fc1_dims,), jnp.float32,
                            -1.0 / np.sqrt(input_size), 1.0 / np.sqrt(input_size))

    v2 = 1.0 / np.sqrt(fc2_dims)                  # fanin_init((300, 400)) -> size[0]
    w2 = jax.random.uniform(k[2], (fc2_dims, fc1_dims), jnp.float32, -v2, v2)
    b2 = jax.random.uniform(k[3], (fc2_dims,), jnp.float32,
                            -1.0 / np.sqrt(fc1_dims), 1.0 / np.sqrt(fc1_dims))

    wmu = jax.random.uniform(k[4], (output_size, fc2_dims), jnp.float32,
                             -init_w, init_w)
    bmu = jax.random.uniform(k[5], (output_size,), jnp.float32,
                             -1.0 / np.sqrt(fc2_dims), 1.0 / np.sqrt(fc2_dims))

    # --- pad to lane multiples and transpose to (in, out) kernel layout ---
    k_pad = _round_up(input_size, 128)
    h1_pad = _round_up(fc1_dims, 128)     # 400 -> 512
    h2_pad = _round_up(fc2_dims, 128)     # 300 -> 384
    out_pad = _round_up(output_size, 128)

    def pad2(a, r, c):
        return jnp.zeros((r, c), jnp.float32).at[:a.shape[0], :a.shape[1]].set(a)

    w1p = pad2(w1.T, k_pad, h1_pad).astype(jnp.bfloat16)
    w2p = pad2(w2.T, h1_pad, h2_pad).astype(jnp.bfloat16)
    wmup = pad2(wmu.T, h2_pad, out_pad).astype(jnp.bfloat16)
    b1p = pad2(b1[None, :], 1, h1_pad)
    b2p = pad2(b2[None, :], 1, h2_pad)
    bmup = pad2(bmu[None, :], 1, out_pad)

    return (w1p, b1p, w2p, b2p, wmup, bmup)


# ----------------------------------------------------------------------------
# Pure-JAX reference (same bf16-weight / f32-accumulate math as the kernel)
# ----------------------------------------------------------------------------
def _reference(x, params, out_dim, min_max_action=1.0):
    w1, b1, w2, b2, wmu, bmu = params
    k_pad = w1.shape[0]
    B, in_dim = x.shape
    x_pad = jnp.zeros((B, k_pad), jnp.float32).at[:, :in_dim].set(x)
    h1 = jax.nn.relu(jnp.dot(x_pad.astype(jnp.bfloat16), w1,
                             preferred_element_type=jnp.float32) + b1)
    h2 = jax.nn.relu(jnp.dot(h1.astype(jnp.bfloat16), w2,
                             preferred_element_type=jnp.float32) + b2)
    mu = min_max_action * jnp.tanh(
        jnp.dot(h2.astype(jnp.bfloat16), wmu,
                preferred_element_type=jnp.float32) + bmu)
    return mu[:, :out_dim]


if __name__ == "__main__":
    B, INPUT_SIZE, OUTPUT_SIZE = 8, 10, 2
    MIN_MAX_ACTION = 1.0

    key = jax.random.PRNGKey(0)
    k_x, k_p = jax.random.split(key, 2)

    x = jax.random.normal(k_x, (B, INPUT_SIZE), dtype=jnp.float32)
    params = make_params(k_p, INPUT_SIZE, OUTPUT_SIZE)

    out = ddpg_actor_forward(x, params, out_dim=OUTPUT_SIZE,
                             min_max_action=MIN_MAX_ACTION)
    out = jax.block_until_ready(out)

    ref = _reference(x, params, OUTPUT_SIZE, MIN_MAX_ACTION)
    assert out.shape == (B, OUTPUT_SIZE), out.shape
    assert bool(jnp.all(jnp.abs(out) <= MIN_MAX_ACTION + 1e-6)), "tanh range"
    assert jnp.allclose(out, ref, atol=1e-3, rtol=1e-3), "mismatch vs JAX reference"
    # TODO(synk): Adam optimizer / checkpoint save-load are host-side training
    # utilities with no Pallas equivalent; only the forward pass is implemented.
    print("KERNEL_OK")
</pallas_src>

<mosaic_0001>
module attributes {stable_mosaic.version = 11 : i64} {
  func.func @ddpg_actor_kernel(%arg0: i32, %arg1: memref<8x128xbf16, #tpu.memory_space<vmem>>, %arg2: memref<128x512xbf16, #tpu.memory_space<vmem>>, %arg3: memref<1x512xf32, #tpu.memory_space<vmem>>, %arg4: memref<512x384xbf16, #tpu.memory_space<vmem>>, %arg5: memref<1x384xf32, #tpu.memory_space<vmem>>, %arg6: memref<384x128xbf16, #tpu.memory_space<vmem>>, %arg7: memref<1x128xf32, #tpu.memory_space<vmem>>, %arg8: memref<8x128xf32, #tpu.memory_space<vmem>>) attributes {dimension_semantics = [#tpu.dimension_semantics<parallel>], iteration_bounds = array<i64: 1>, scalar_prefetch = 0 : i64, scratch_operands = 0 : i64, tpu.core_type = #tpu.core_type<tc>, window_params = [{transform_indices = @transform_0, window_bounds = array<i64: 8, 128>}, {pipeline_mode = #tpu.pipeline_mode<synchronous>, transform_indices = @transform_1, window_bounds = array<i64: 128, 512>}, {pipeline_mode = #tpu.pipeline_mode<synchronous>, transform_indices = @transform_2, window_bounds = array<i64: 1, 512>}, {pipeline_mode = #tpu.pipeline_mode<synchronous>, transform_indices = @transform_3, window_bounds = array<i64: 512, 384>}, {pipeline_mode = #tpu.pipeline_mode<synchronous>, transform_indices = @transform_4, window_bounds = array<i64: 1, 384>}, {pipeline_mode = #tpu.pipeline_mode<synchronous>, transform_indices = @transform_5, window_bounds = array<i64: 384, 128>}, {pipeline_mode = #tpu.pipeline_mode<synchronous>, transform_indices = @transform_6, window_bounds = array<i64: 1, 128>}, {transform_indices = @transform_7, window_bounds = array<i64: 8, 128>}]} {
    %c0 = arith.constant 0 : index
    %c0_0 = arith.constant 0 : index
    %0 = vector.load %arg1[%c0, %c0_0] : memref<8x128xbf16, #tpu.memory_space<vmem>>, vector<8x128xbf16>
    %c0_1 = arith.constant 0 : index
    %c0_2 = arith.constant 0 : index
    %1 = vector.load %arg2[%c0_1, %c0_2] : memref<128x512xbf16, #tpu.memory_space<vmem>>, vector<128x512xbf16>
    %cst = arith.constant dense<0.000000e+00> : vector<8x512xf32>
    %2 = tpu.matmul %0, %1, %cst {dimension_numbers = #tpu.dot_dimension_numbers<[1], [0], [0], [1], [0, 0, 1, 1], [], []>} : vector<8x128xbf16>, vector<128x512xbf16>, vector<8x512xf32> -> vector<8x512xf32>
    %c0_3 = arith.constant 0 : index
    %c0_4 = arith.constant 0 : index
    %3 = vector.load %arg3[%c0_3, %c0_4] : memref<1x512xf32, #tpu.memory_space<vmem>>, vector<1x512xf32>
    %4 = vector.broadcast %3 : vector<1x512xf32> to vector<8x512xf32>
    %5 = arith.addf %2, %4 : vector<8x512xf32>
    %cst_5 = arith.constant 0.000000e+00 : f32
    %6 = vector.broadcast %cst_5 : f32 to vector<8x512xf32>
    %7 = arith.maximumf %5, %6 : vector<8x512xf32>
    %8 = arith.truncf %7 : vector<8x512xf32> to vector<8x512xbf16>
    %c0_6 = arith.constant 0 : index
    %c0_7 = arith.constant 0 : index
    %9 = vector.load %arg4[%c0_6, %c0_7] : memref<512x384xbf16, #tpu.memory_space<vmem>>, vector<512x384xbf16>
    %cst_8 = arith.constant dense<0.000000e+00> : vector<8x384xf32>
    %10 = tpu.matmul %8, %9, %cst_8 {dimension_numbers = #tpu.dot_dimension_numbers<[1], [0], [0], [1], [0, 0, 1, 1], [], []>} : vector<8x512xbf16>, vector<512x384xbf16>, vector<8x384xf32> -> vector<8x384xf32>
    %c0_9 = arith.constant 0 : index
    %c0_10 = arith.constant 0 : index
    %11 = vector.load %arg5[%c0_9, %c0_10] : memref<1x384xf32, #tpu.memory_space<vmem>>, vector<1x384xf32>
    %12 = vector.broadcast %11 : vector<1x384xf32> to vector<8x384xf32>
    %13 = arith.addf %10, %12 : vector<8x384xf32>
    %cst_11 = arith.constant 0.000000e+00 : f32
    %14 = vector.broadcast %cst_11 : f32 to vector<8x384xf32>
    %15 = arith.maximumf %13, %14 : vector<8x384xf32>
    %16 = arith.truncf %15 : vector<8x384xf32> to vector<8x384xbf16>
    %c0_12 = arith.constant 0 : index
    %c0_13 = arith.constant 0 : index
    %17 = vector.load %arg6[%c0_12, %c0_13] : memref<384x128xbf16, #tpu.memory_space<vmem>>, vector<384x128xbf16>
    %cst_14 = arith.constant dense<0.000000e+00> : vector<8x128xf32>
    %18 = tpu.matmul %16, %17, %cst_14 {dimension_numbers = #tpu.dot_dimension_numbers<[1], [0], [0], [1], [0, 0, 1, 1], [], []>} : vector<8x384xbf16>, vector<384x128xbf16>, vector<8x128xf32> -> vector<8x128xf32>
    %c0_15 = arith.constant 0 : index
    %c0_16 = arith.constant 0 : index
    %19 = vector.load %arg7[%c0_15, %c0_16] : memref<1x128xf32, #tpu.memory_space<vmem>>, vector<1x128xf32>
    %20 = vector.broadcast %19 : vector<1x128xf32> to vector<8x128xf32>
    %21 = arith.addf %18, %20 : vector<8x128xf32>
    %22 = math.tanh %21 : vector<8x128xf32>
    %cst_17 = arith.constant 1.000000e+00 : f32
    %23 = vector.broadcast %cst_17 : f32 to vector<8x128xf32>
    %24 = arith.mulf %23, %22 : vector<8x128xf32>
    %c0_18 = arith.constant 0 : index
    %c0_19 = arith.constant 0 : index
    %25 = vector.load %arg8[%c0_18, %c0_19] : memref<8x128xf32, #tpu.memory_space<vmem>>, vector<8x128xf32>
    tpu.vector_store %arg8[%c0_18, %c0_19], %24 {strides = array<i32>} : memref<8x128xf32, #tpu.memory_space<vmem>>, vector<8x128xf32>,
    return
  }
  func.func @transform_0(%arg0: i32) -> (i32, i32) {
    %c0_i32 = arith.constant 0 : i32
    %c0_i32_0 = arith.constant 0 : i32
    return %arg0, %c0_i32 : i32, i32
  }
  func.func @transform_1(%arg0: i32) -> (i32, i32) {
    %c0_i32 = arith.constant 0 : i32
    %c0_i32_0 = arith.constant 0 : i32
    %c0_i32_1 = arith.constant 0 : i32
    return %c0_i32, %c0_i32_0 : i32, i32
  }
  func.func @transform_2(%arg0: i32) -> (i32, i32) {
    %c0_i32 = arith.constant 0 : i32
    %c0_i32_0 = arith.constant 0 : i32
    %c0_i32_1 = arith.constant 0 : i32
    return %c0_i32, %c0_i32_0 : i32, i32
  }
  func.func @transform_3(%arg0: i32) -> (i32, i32) {
    %c0_i32 = arith.constant 0 : i32
    %c0_i32_0 = arith.constant 0 : i32
    %c0_i32_1 = arith.constant 0 : i32
    return %c0_i32, %c0_i32_0 : i32, i32
  }
  func.func @transform_4(%arg0: i32) -> (i32, i32) {
    %c0_i32 = arith.constant 0 : i32
    %c0_i32_0 = arith.constant 0 : i32
    %c0_i32_1 = arith.constant 0 : i32
    return %c0_i32, %c0_i32_0 : i32, i32
  }
  func.func @transform_5(%arg0: i32) -> (i32, i32) {
    %c0_i32 = arith.constant 0 : i32
    %c0_i32_0 = arith.constant 0 : i32
    %c0_i32_1 = arith.constant 0 : i32
    return %c0_i32, %c0_i32_0 : i32, i32
  }
  func.func @transform_6(%arg0: i32) -> (i32, i32) {
    %c0_i32 = arith.constant 0 : i32
    %c0_i32_0 = arith.constant 0 : i32
    %c0_i32_1 = arith.constant 0 : i32
    return %c0_i32, %c0_i32_0 : i32, i32
  }
  func.func @transform_7(%arg0: i32) -> (i32, i32) {
    %c0_i32 = arith.constant 0 : i32
    %c0_i32_0 = arith.constant 0 : i32
    return %arg0, %c0_i32 : i32, i32
  }
}

</mosaic_0001>

<bundles_post_ra>
// kernel: tpu_custom_call.1
= control target key start
LH: loop header
LB: loop body
LE: loop exit
PB: predicated region body
PF: predicated region fallthrough
CT: control target
= control target key end

     0   :  { %12 = vsyncpa [#allocation3], 0  ;;  %s2453_s0 = inlined_call_operand.hbm [shape: bf16[8,128], index: 0, kind: input, shape index: {}]   ;;  %s2454_s1 = inlined_call_operand.hbm [shape: bf16[128,512], index: 1, kind: input, shape index: {}]   ;;  %s2455_s2 = inlined_call_operand.hbm [shape: f32[1,512], index: 2, kind: input, shape index: {}]   ;;  %s2456_s3 = inlined_call_operand.hbm [shape: bf16[512,384], index: 3, kind: input, shape index: {}]   ;;  %s2457_s4 = inlined_call_operand.vmem [shape: f32[1,384], index: 4, kind: input, shape index: {}]   ;;  %s2458_s5 = inlined_call_operand.hbm [shape: bf16[384,128], index: 5, kind: input, shape index: {}]   ;;  %s2459_s6 = inlined_call_operand.vmem [shape: f32[1,128], index: 6, kind: input, shape index: {}]   ;;  %s2460_s7 = inlined_call_operand.hbm [shape: f32[8,128], index: 7, kind: output, shape index: {}]  }
   0x1   :  { %13 = vsyncpa [#allocation6], 0 }
   0x2   :  { %14 = vsyncpa [#allocation9], 0  ;;  %s31_s26 = sshll.u32 %s2454_s1, 4  ;;  %s32_s26 = int_to_ptr.hbm [resolvable:$true] %s31_s26 }
   0x3   :  { %15 = vsyncpa [#allocation4], 0  ;;  %s2357_s27 = smov [#allocation5]   ;;  %s55_s8 = sshll.u32 %s2456_s3, 4  ;;  %s56_s8 = int_to_ptr.hbm [resolvable:$true] %s55_s8 }
   0x4   :  { %s33_s28 = sshll.u32 %s2357_s27, 4  ;;  %s2358_s9 = smov 256   ;;  %s34_s28 = int_to_ptr.vmem [resolvable:$true] %s33_s28 }
   0x5   :  { %s2359_s10 = smov 16   ;;  %s2360_s11 = smov [#allocation8]  }
   0x6   :  { %39 = dma.hbm_to_vmem [thread:$0]  %s32_s26, 4096, %s34_s28, [#allocation6], %s2358_s9, %s2358_s9, %s2359_s10  }
   0x7   :  { %s57_s12 = sshll.u32 %s2360_s11, 4  ;;  %s2361_s13 = smov 192   ;;  %s58_s12 = int_to_ptr.vmem [resolvable:$true] %s57_s12 }
   0x8   :  { %s2362_s14 = smov 12   ;;  %s21_s16 = sshll.u32 %s2453_s0, 4  ;;  %s22_s16 = int_to_ptr.hbm [resolvable:$true] %s21_s16 }
   0x9   :  { %63 = dma.hbm_to_vmem [thread:$0]  %s56_s8, 12288, %s58_s12, [#allocation9], %s2361_s13, %s2361_s13, %s2362_s14  }
   0xa   :  { %s2363_s17 = smov [#allocation2]   ;;  %s45_s20 = sshll.u32 %s2455_s2, 4  ;;  %s46_s20 = int_to_ptr.hbm [resolvable:$true] %s45_s20 }
   0xb   :  { %s23_s18 = sshll.u32 %s2363_s17, 4  ;;  %s2364_s21 = smov [#allocation7]   ;;  %s24_s18 = int_to_ptr.vmem [resolvable:$true] %s23_s18 }
   0xc   :  { %26 = dma.hbm_to_vmem [thread:$0]  %s22_s16, 64, %s24_s18, [#allocation3]  }
   0xd   :  { %s47_s22 = sshll.u32 %s2364_s21, 4  ;;  %s70_s25 = sshll.u32 %s2458_s5, 4  ;;  %s48_s22 = int_to_ptr.vmem [resolvable:$true] %s47_s22  ;;  %s71_s25 = int_to_ptr.hbm [resolvable:$true] %s70_s25 }
   0xe   :  { %50 = dma.hbm_to_vmem [thread:$0]  %s46_s20, 64, %s48_s22, [#allocation6]  }
   0xf   :  { %s2365_s0 = smov [#allocation10]   ;;  %s2366_s27 = smov 64  }
  0x10   :  { %s72_s26 = sshll.u32 %s2365_s0, 4  ;;  %s2367_s28 = smov 4   ;;  %s73_s26 = int_to_ptr.vmem [resolvable:$true] %s72_s26 }
  0x11   :  { %78 = dma.hbm_to_vmem [thread:$0]  %s71_s25, 3072, %s73_s26, [#allocation9], %s2366_s27, %s2366_s27, %s2367_s28  }
  0x12   :  { %2349 = dma.done.wait [#allocation3], 64  }
  0x13   :  { %2350 = vsyncadd [#allocation3], 4294967232 }
  0x14   :  { %2351 = dma.done.wait [#allocation6], 4160  }
  0x15   :  { %2352 = vsyncadd [#allocation6], 4294963136 }
  0x16   :  { %2353 = dma.done.wait [#allocation9], 15360  }
  0x17   :  { %2354 = vsyncadd [#allocation9], 4294951936  ;;  %v1544_v0 = vld [vmem:[#allocation5 + $0xe0] sm:$0xf]  ;;  %v2068_v1 = vld [vmem:[#allocation5 + $0xec] sm:$0xf0] }
  0x18   :  { %v2066_v2 = vld [vmem:[#allocation5 + $0xe4] sm:$0xf]  ;;  %v1545_v3 = vor.u32 %v2068_v1, %v1544_v0  ;;  %v1546_v4 = vld [vmem:[#allocation5 + $0xf0] sm:$0xf0]  ;;  %v1552_v5 = vld [vmem:[#allocation5 + $0xe8] sm:$0xf] }
  0x19   :  { %v2069_v6 = vld [vmem:[#allocation5 + $0xf4] sm:$0xf0]  ;;  %v1549_v7 = vor.u32 %v2066_v2, %v1546_v4  ;;  %v2067_v9 = vld [vmem:[#allocation5 + $0xec] sm:$0xf]  ;;  %v1554_v10 = vld [vmem:[#allocation5 + $0xf8] sm:$0xf0] }
  0x1a   :  { %v1553_v8 = vor.u32 %v2069_v6, %v1552_v5  ;;  %v1528_v11 = vld [vmem:[#allocation5 + $0xc0] sm:$0xf]  ;;  %304 = vmatpush.bf16.msra.mxu0 %v1545_v3  ;;  %v1557_v12 = vor.u32 %v2067_v9, %v1554_v10  ;;  %v2064_v13 = vld [vmem:[#allocation5 + $0xcc] sm:$0xf0]  ;;  %v2062_v14 = vld [vmem:[#allocation5 + $0xc4] sm:$0xf] }
  0x1b   :  { %v1530_v15 = vld [vmem:[#allocation5 + $0xd0] sm:$0xf0]  ;;  %317 = vmatpush.bf16.msra.mxu1 %v1549_v7  ;;  %v1529_v16 = vor.u32 %v2064_v13, %v1528_v11  ;;  %v1536_v18 = vld [vmem:[#allocation5 + $0xc8] sm:$0xf]  ;;  %v2065_v19 = vld [vmem:[#allocation5 + $0xd4] sm:$0xf0] }
  0x1c   :  { %330 = vmatpush.bf16.msra.mxu2 %v1553_v8  ;;  %v1533_v17 = vor.u32 %v2062_v14, %v1530_v15  ;;  %v2063_v20 = vld [vmem:[#allocation5 + $0xcc] sm:$0xf]  ;;  %343 = vmatpush.bf16.msra.mxu3 %v1557_v12  ;;  %v1537_v21 = vor.u32 %v2065_v19, %v1536_v18  ;;  %v1538_v22 = vld [vmem:[#allocation5 + $0xd8] sm:$0xf0]  ;;  %v1512_v23 = vld [vmem:[#allocation5 + $0xa0] sm:$0xf] }
  0x1d   :  { %v2060_v24 = vld [vmem:[#allocation5 + $0xac] sm:$0xf0]  ;;  %v1541_v25 = vor.u32 %v2063_v20, %v1538_v22  ;;  %v2058_v26 = vld [vmem:[#allocation5 + $0xa4] sm:$0xf]  ;;  %v1514_v27 = vld [vmem:[#allocation5 + $0xb0] sm:$0xf0] }
  0x1e   :  { %v1520_v28 = vld [vmem:[#allocation5 + $0xa8] sm:$0xf]  ;;  %305 = vmatpush.bf16.msra.mxu0 %v1529_v16  ;;  %v1513_v29 = vor.u32 %v2060_v24, %v1512_v23  ;;  %v2061_v30 = vld [vmem:[#allocation5 + $0xb4] sm:$0xf0]  ;;  %v2059_v31 = vld [vmem:[#allocation5 + $0xac] sm:$0xf]  ;;  %v1517_v33 = vor.u32 %v2058_v26, %v1514_v27 }
  0x1f   :  { %v1522_v32 = vld [vmem:[#allocation5 + $0xb8] sm:$0xf0]  ;;  %318 = vmatpush.bf16.msra.mxu1 %v1533_v17  ;;  %v1521_v34 = vor.u32 %v2061_v30, %v1520_v28  ;;  %v1496_v35 = vld [vmem:[#allocation5 + $0x80] sm:$0xf]  ;;  %v2056_v36 = vld [vmem:[#allocation5 + $0x8c] sm:$0xf0] }
  0x20   :  { %331 = vmatpush.bf16.msra.mxu2 %v1537_v21  ;;  %v2054_v37 = vld [vmem:[#allocation5 + $0x84] sm:$0xf]  ;;  %344 = vmatpush.bf16.msra.mxu3 %v1541_v25  ;;  %v1525_v38 = vor.u32 %v2059_v31, %v1522_v32  ;;  %v1498_v39 = vld [vmem:[#allocation5 + $0x90] sm:$0xf0]  ;;  %v1504_v40 = vld [vmem:[#allocation5 + $0x88] sm:$0xf]  ;;  %v1497_v44 = vor.u32 %v2056_v36, %v1496_v35 }
  0x21   :  { %v2057_v41 = vld [vmem:[#allocation5 + $0x94] sm:$0xf0]  ;;  %v2055_v42 = vld [vmem:[#allocation5 + $0x8c] sm:$0xf]  ;;  %v1506_v43 = vld [vmem:[#allocation5 + $0x98] sm:$0xf0]  ;;  %v1501_v45 = vor.u32 %v2054_v37, %v1498_v39 }
  0x22   :  { %306 = vmatpush.bf16.msra.mxu0 %v1513_v29  ;;  %v1505_v46 = vor.u32 %v2057_v41, %v1504_v40  ;;  %v1480_v47 = vld [vmem:[#allocation5 + $0x60] sm:$0xf]  ;;  %v2052_v48 = vld [vmem:[#allocation5 + $0x6c] sm:$0xf0]  ;;  %v2050_v49 = vld [vmem:[#allocation5 + $0x64] sm:$0xf]  ;;  %v1509_v50 = vor.u32 %v2055_v42, %v1506_v43 }
  0x23   :  { %319 = vmatpush.bf16.msra.mxu1 %v1517_v33  ;;  %v1482_v51 = vld [vmem:[#allocation5 + $0x70] sm:$0xf0]  ;;  %v1488_v52 = vld [vmem:[#allocation5 + $0x68] sm:$0xf]  ;;  %v2053_v53 = vld [vmem:[#allocation5 + $0x74] sm:$0xf0]  ;;  %v1481_v56 = vor.u32 %v2052_v48, %v1480_v47 }
  0x24   :  { %332 = vmatpush.bf16.msra.mxu2 %v1521_v34  ;;  %345 = vmatpush.bf16.msra.mxu3 %v1525_v38  ;;  %v2051_v54 = vld [vmem:[#allocation5 + $0x6c] sm:$0xf]  ;;  %v1490_v55 = vld [vmem:[#allocation5 + $0x78] sm:$0xf0]  ;;  %v1485_v57 = vor.u32 %v2050_v49, %v1482_v51  ;;  %v1489_v58 = vor.u32 %v2053_v53, %v1488_v52  ;;  %v1464_v59 = vld [vmem:[#allocation5 + $0x40] sm:$0xf] }
  0x25   :  { %v2048_v60 = vld [vmem:[#allocation5 + $0x4c] sm:$0xf0]  ;;  %v2046_v61 = vld [vmem:[#allocation5 + $0x44] sm:$0xf]  ;;  %v1493_v62 = vor.u32 %v2051_v54, %v1490_v55  ;;  %v1466_v63 = vld [vmem:[#allocation5 + $0x50] sm:$0xf0] }
  0x26   :  { %307 = vmatpush.bf16.msra.mxu0 %v1497_v44  ;;  %v1472_v0 = vld [vmem:[#allocation5 + $0x48] sm:$0xf]  ;;  %v2049_v1 = vld [vmem:[#allocation5 + $0x54] sm:$0xf0]  ;;  %v2047_v2 = vld [vmem:[#allocation5 + $0x4c] sm:$0xf]  ;;  %v1465_v4 = vor.u32 %v2048_v60, %v1464_v59  ;;  %v1469_v5 = vor.u32 %v2046_v61, %v1466_v63 }
  0x27   :  { %320 = vmatpush.bf16.msra.mxu1 %v1501_v45  ;;  %v1474_v3 = vld [vmem:[#allocation5 + $0x58] sm:$0xf0]  ;;  %v1473_v6 = vor.u32 %v2049_v1, %v1472_v0  ;;  %v1448_v7 = vld [vmem:[#allocation5 + $0x20] sm:$0xf]  ;;  %v2044_v8 = vld [vmem:[#allocation5 + $0x2c] sm:$0xf0] }
  0x28   :  { %333 = vmatpush.bf16.msra.mxu2 %v1505_v46  ;;  %346 = vmatpush.bf16.msra.mxu3 %v1509_v50  ;;  %v2042_v9 = vld [vmem:[#allocation5 + $0x24] sm:$0xf]  ;;  %v1477_v10 = vor.u32 %v2047_v2, %v1474_v3  ;;  %v1450_v11 = vld [vmem:[#allocation5 + $0x30] sm:$0xf0]  ;;  %v1456_v12 = vld [vmem:[#allocation5 + $0x28] sm:$0xf]  ;;  %v1449_v16 = vor.u32 %v2044_v8, %v1448_v7 }
  0x29   :  { %v2045_v13 = vld [vmem:[#allocation5 + $0x34] sm:$0xf0]  ;;  %v2043_v14 = vld [vmem:[#allocation5 + $0x2c] sm:$0xf]  ;;  %v1458_v15 = vld [vmem:[#allocation5 + $0x38] sm:$0xf0]  ;;  %v1453_v18 = vor.u32 %v2042_v9, %v1450_v11 }
  0x2a   :  { %308 = vmatpush.bf16.msra.mxu0 %v1481_v56  ;;  %v1432_v17 = vld [vmem:[#allocation5] sm:$0xf]  ;;  %v1457_v19 = vor.u32 %v2045_v13, %v1456_v12  ;;  %v2040_v20 = vld [vmem:[#allocation5 + $0xc] sm:$0xf0]  ;;  %v2038_v21 = vld [vmem:[#allocation5 + $0x4] sm:$0xf]  ;;  %v1461_v23 = vor.u32 %v2043_v14, %v1458_v15 }
  0x2b   :  { %321 = vmatpush.bf16.msra.mxu1 %v1485_v57  ;;  %v1434_v22 = vld [vmem:[#allocation5 + $0x10] sm:$0xf0]  ;;  %v1440_v24 = vld [vmem:[#allocation5 + $0x8] sm:$0xf]  ;;  %v2041_v25 = vld [vmem:[#allocation5 + $0x14] sm:$0xf0]  ;;  %v1433_v30 = vor.u32 %v2040_v20, %v1432_v17 }
  0x2c   :  { %334 = vmatpush.bf16.msra.mxu2 %v1489_v58  ;;  %347 = vmatpush.bf16.msra.mxu3 %v1493_v62  ;;  %v2039_v26 = vld [vmem:[#allocation5 + $0xc] sm:$0xf]  ;;  %v1442_v27 = vld [vmem:[#allocation5 + $0x18] sm:$0xf0]  ;;  %v2092_v29 = vld [vmem:[#allocation8 + $0xb0] sm:$0xf0]  ;;  %v1437_v33 = vor.u32 %v2038_v21, %v1434_v22  ;;  %v1441_v34 = vor.u32 %v2041_v25, %v1440_v24 }
  0x2d   :  { %v1644_v28 = vld [vmem:[#allocation8 + $0xa8] sm:$0xf]  ;;  %v2116_v32 = vld [vmem:[#allocation8 + $0x170] sm:$0xf0]  ;;  %v1445_v35 = vor.u32 %v2039_v26, %v1442_v27  ;;  %v1632_v37 = vld [vmem:[#allocation8 + $0x90] sm:$0xf] }
  0x2e   :  { %309 = vmatpush.bf16.msra.mxu0 %v1465_v4  ;;  %v1740_v31 = vld [vmem:[#allocation8 + $0x168] sm:$0xf]  ;;  %v1645_v36 = vor.u32 %v2092_v29, %v1644_v28  ;;  %v2140_v39 = vld [vmem:[#allocation8 + $0x230] sm:$0xf0]  ;;  %v2089_v41 = vld [vmem:[#allocation8 + $0x98] sm:$0xf0] }
  0x2f   :  { %322 = vmatpush.bf16.msra.mxu1 %v1469_v5  ;;  %v1836_v38 = vld [vmem:[#allocation8 + $0x228] sm:$0xf]  ;;  %v1741_v40 = vor.u32 %v2116_v32, %v1740_v31  ;;  %v2164_v43 = vld [vmem:[#allocation8 + $0x2f0] sm:$0xf0]  ;;  %v101_v44 = vld [vmem:[#allocation2] sm:$0xf]  ;;  %v1633_v48 = vor.u32 %v2089_v41, %v1632_v37 }
  0x30   :  { %335 = vmatpush.bf16.msra.mxu2 %v1473_v6  ;;  %348 = vmatpush.bf16.msra.mxu3 %v1477_v10  ;;  %v1932_v42 = vld [vmem:[#allocation8 + $0x2e8] sm:$0xf]  ;;  %v1728_v45 = vld [vmem:[#allocation8 + $0x150] sm:$0xf]  ;;  %v2113_v46 = vld [vmem:[#allocation8 + $0x158] sm:$0xf0]  ;;  %v1837_v47 = vor.u32 %v2140_v39, %v1836_v38 }
  0x31   :  { %v1933_v49 = vor.u32 %v2164_v43, %v1932_v42  ;;  %v1620_v50 = vld [vmem:[#allocation8 + $0x78] sm:$0xf]  ;;  %v1824_v51 = vld [vmem:[#allocation8 + $0x210] sm:$0xf]  ;;  %v2137_v52 = vld [vmem:[#allocation8 + $0x218] sm:$0xf0]  ;;  %v1729_v53 = vor.u32 %v2113_v46, %v1728_v45 }
  0x32   :  { %310 = vmatpush.bf16.msra.mxu0 %v1449_v16  ;;  %v2086_v54 = vld [vmem:[#allocation8 + $0x80] sm:$0xf0]  ;;  %v1920_v55 = vld [vmem:[#allocation8 + $0x2d0] sm:$0xf]  ;;  %v2161_v56 = vld [vmem:[#allocation8 + $0x2d8] sm:$0xf0]  ;;  %v1825_v59 = vor.u32 %v2137_v52, %v1824_v51 }
  0x33   :  { %323 = vmatpush.bf16.msra.mxu1 %v1453_v18  ;;  %v1716_v57 = vld [vmem:[#allocation8 + $0x138] sm:$0xf]  ;;  %v2110_v58 = vld [vmem:[#allocation8 + $0x140] sm:$0xf0]  ;;  %v1621_v60 = vor.u32 %v2086_v54, %v1620_v50  ;;  %v1921_v61 = vor.u32 %v2161_v56, %v1920_v55  ;;  %v1608_v62 = vld [vmem:[#allocation8 + $0x60] sm:$0xf] }
  0x34   :  { %336 = vmatpush.bf16.msra.mxu2 %v1457_v19  ;;  %349 = vmatpush.bf16.msra.mxu3 %v1461_v23  ;;  %v1812_v63 = vld [vmem:[#allocation8 + $0x1f8] sm:$0xf]  ;;  %v2134_v0 = vld [vmem:[#allocation8 + $0x200] sm:$0xf0]  ;;  %v1717_v1 = vor.u32 %v2110_v58, %v1716_v57  ;;  %v2083_v2 = vld [vmem:[#allocation8 + $0x68] sm:$0xf0] }
  0x35   :  { %v1908_v3 = vld [vmem:[#allocation8 + $0x2b8] sm:$0xf]  ;;  %v2158_v4 = vld [vmem:[#allocation8 + $0x2c0] sm:$0xf0]  ;;  %v1704_v5 = vld [vmem:[#allocation8 + $0x120] sm:$0xf]  ;;  %v1813_v7 = vor.u32 %v2134_v0, %v1812_v63  ;;  %v1609_v8 = vor.u32 %v2083_v2, %v1608_v62 }
  0x36   :  { %311 = vmatpush.bf16.msra.mxu0 %v1433_v30  ;;  %v2107_v6 = vld [vmem:[#allocation8 + $0x128] sm:$0xf0]  ;;  %v1909_v9 = vor.u32 %v2158_v4, %v1908_v3  ;;  %v1596_v10 = vld [vmem:[#allocation8 + $0x48] sm:$0xf]  ;;  %v1800_v11 = vld [vmem:[#allocation8 + $0x1e0] sm:$0xf] }
  0x37   :  { %324 = vmatpush.bf16.msra.mxu1 %v1437_v33  ;;  %v2131_v12 = vld [vmem:[#allocation8 + $0x1e8] sm:$0xf0]  ;;  %v1705_v13 = vor.u32 %v2107_v6, %v1704_v5  ;;  %v2080_v14 = vld [vmem:[#allocation8 + $0x50] sm:$0xf0]  ;;  %v1896_v15 = vld [vmem:[#allocation8 + $0x2a0] sm:$0xf] }
  0x38   :  { %337 = vmatpush.bf16.msra.mxu2 %v1441_v34  ;;  %350 = vmatpush.bf16.msra.mxu3 %v1445_v35  ;;  %v2155_v16 = vld [vmem:[#allocation8 + $0x2a8] sm:$0xf0]  ;;  %v1692_v17 = vld [vmem:[#allocation8 + $0x108] sm:$0xf]  ;;  %v2104_v18 = vld [vmem:[#allocation8 + $0x110] sm:$0xf0]  ;;  %v1801_v19 = vor.u32 %v2131_v12, %v1800_v11  ;;  %v1597_v20 = vor.u32 %v2080_v14, %v1596_v10 }
  0x39   :  { %312 = vmatmul.bf16.vlgmr.msra.gmra.mxu0 %v101_v44  ;;  %v1897_v21 = vor.u32 %v2155_v16, %v1896_v15  ;;  %v1584_v22 = vld [vmem:[#allocation8 + $0x30] sm:$0xf]  ;;  %v1788_v23 = vld [vmem:[#allocation8 + $0x1c8] sm:$0xf]  ;;  %v2128_v24 = vld [vmem:[#allocation8 + $0x1d0] sm:$0xf0]  ;;  %v1693_v25 = vor.u32 %v2104_v18, %v1692_v17 }
  0x3a   :  { %1012 = vmatpush.bf16.msrb.mxu0 %v1645_v36  ;;  %325 = vmatmul.bf16.vlgmr.msra.gmra.mxu1 %v101_v44  ;;  %v2077_v26 = vld [vmem:[#allocation8 + $0x38] sm:$0xf0]  ;;  %v1884_v27 = vld [vmem:[#allocation8 + $0x288] sm:$0xf]  ;;  %v2152_v28 = vld [vmem:[#allocation8 + $0x290] sm:$0xf0]  ;;  %v1789_v31 = vor.u32 %v2128_v24, %v1788_v23 }
  0x3b   :  { %1025 = vmatpush.bf16.msrb.mxu1 %v1741_v40  ;;  %338 = vmatmul.bf16.vlgmr.msra.gmra.mxu2 %v101_v44  ;;  %v1680_v29 = vld [vmem:[#allocation8 + $0xf0] sm:$0xf]  ;;  %v2101_v30 = vld [vmem:[#allocation8 + $0xf8] sm:$0xf0]  ;;  %v1585_v32 = vor.u32 %v2077_v26, %v1584_v22  ;;  %v1885_v33 = vor.u32 %v2152_v28, %v1884_v27  ;;  %v1572_v34 = vld [vmem:[#allocation8 + $0x18] sm:$0xf] }
  0x3c   :  { %351 = vmatmul.bf16.vlgmr.msra.gmra.mxu3 %v101_v44  ;;  %1038 = vmatpush.bf16.msrb.mxu2 %v1837_v47  ;;  %v1776_v35 = vld [vmem:[#allocation8 + $0x1b0] sm:$0xf]  ;;  %v2125_v36 = vld [vmem:[#allocation8 + $0x1b8] sm:$0xf0]  ;;  %v1681_v37 = vor.u32 %v2101_v30, %v1680_v29  ;;  %v2074_v38 = vld [vmem:[#allocation8 + $0x20] sm:$0xf0] }
  0x3d   :  { %1051 = vmatpush.bf16.msrb.mxu3 %v1933_v49  ;;  %v1872_v39 = vld [vmem:[#allocation8 + $0x270] sm:$0xf]  ;;  %v2149_v40 = vld [vmem:[#allocation8 + $0x278] sm:$0xf0]  ;;  %v1668_v41 = vld [vmem:[#allocation8 + $0xd8] sm:$0xf]  ;;  %v1777_v43 = vor.u32 %v2125_v36, %v1776_v35  ;;  %v1573_v45 = vor.u32 %v2074_v38, %v1572_v34 }
  0x3e   :  { %1013 = vmatpush.bf16.msrb.mxu0 %v1633_v48  ;;  %v2098_v42 = vld [vmem:[#allocation8 + $0xe0] sm:$0xf0]  ;;  %v1560_v44 = vld [vmem:[#allocation8] sm:$0xf]  ;;  %v1873_v46 = vor.u32 %v2149_v40, %v1872_v39  ;;  %v2071_v47 = vld [vmem:[#allocation8 + $0x8] sm:$0xf0] }
  0x3f   :  { %1026 = vmatpush.bf16.msrb.mxu1 %v1729_v53  ;;  %v1764_v48 = vld [vmem:[#allocation8 + $0x198] sm:$0xf]  ;;  %v2122_v49 = vld [vmem:[#allocation8 + $0x1a0] sm:$0xf0]  ;;  %v1669_v50 = vor.u32 %v2098_v42, %v1668_v41  ;;  %v1656_v51 = vld [vmem:[#allocation8 + $0xc0] sm:$0xf] }
  0x40   :  { %1039 = vmatpush.bf16.msrb.mxu2 %v1825_v59  ;;  %v1860_v52 = vld [vmem:[#allocation8 + $0x258] sm:$0xf]  ;;  %v2146_v53 = vld [vmem:[#allocation8 + $0x260] sm:$0xf0]  ;;  %v2095_v54 = vld [vmem:[#allocation8 + $0xc8] sm:$0xf0]  ;;  %v1765_v59 = vor.u32 %v2122_v49, %v1764_v48 }
  0x41   :  { %1052 = vmatpush.bf16.msrb.mxu3 %v1921_v61  ;;  %v2091_v55 = vld [vmem:[#allocation8 + $0xac] sm:$0xf]  ;;  %v1646_v56 = vld [vmem:[#allocation8 + $0xb4] sm:$0xf0]  ;;  %v1861_v61 = vor.u32 %v2146_v53, %v1860_v52  ;;  %v2088_v62 = vld [vmem:[#allocation8 + $0x94] sm:$0xf]  ;;  %v1657_v2 = vor.u32 %v2095_v54, %v1656_v51 }
  0x42   :  { %1014 = vmatpush.bf16.msrb.mxu0 %v1621_v60  ;;  %v2115_v57 = vld [vmem:[#allocation8 + $0x16c] sm:$0xf]  ;;  %v1742_v58 = vld [vmem:[#allocation8 + $0x174] sm:$0xf0]  ;;  %v1561_v60 = vor.u32 %v2071_v47, %v1560_v44  ;;  %v1752_v63 = vld [vmem:[#allocation8 + $0x180] sm:$0xf]  ;;  %v1649_v3 = vor.u32 %v2091_v55, %v1646_v56 }
  0x43   :  { %1027 = vmatpush.bf16.msrb.mxu1 %v1717_v1  ;;  %v2119_v0 = vld [vmem:[#allocation8 + $0x188] sm:$0xf0]  ;;  %v1848_v1 = vld [vmem:[#allocation8 + $0x240] sm:$0xf]  ;;  %v1838_v6 = vld [vmem:[#allocation8 + $0x234] sm:$0xf0] }
  0x44   :  { %1040 = vmatpush.bf16.msrb.mxu2 %v1813_v7  ;;  %v2143_v4 = vld [vmem:[#allocation8 + $0x248] sm:$0xf0]  ;;  %v1745_v7 = vor.u32 %v2115_v57, %v1742_v58  ;;  %v1934_v10 = vld [vmem:[#allocation8 + $0x2f4] sm:$0xf0]  ;;  %v2112_v11 = vld [vmem:[#allocation8 + $0x154] sm:$0xf] }
  0x45   :  { %1053 = vmatpush.bf16.msrb.mxu3 %v1909_v9  ;;  %v2139_v5 = vld [vmem:[#allocation8 + $0x22c] sm:$0xf]  ;;  %v1730_v12 = vld [vmem:[#allocation8 + $0x15c] sm:$0xf0]  ;;  %v1849_v14 = vor.u32 %v2143_v4, %v1848_v1  ;;  %v2085_v18 = vld [vmem:[#allocation8 + $0x7c] sm:$0xf] }
  0x46   :  { %1015 = vmatpush.bf16.msrb.mxu0 %v1609_v8  ;;  %v1634_v8 = vld [vmem:[#allocation8 + $0x9c] sm:$0xf0]  ;;  %v2163_v9 = vld [vmem:[#allocation8 + $0x2ec] sm:$0xf]  ;;  %v1841_v15 = vor.u32 %v2139_v5, %v1838_v6  ;;  %v1622_v22 = vld [vmem:[#allocation8 + $0x84] sm:$0xf0] }
  0x47   :  { %1028 = vmatpush.bf16.msrb.mxu1 %v1705_v13  ;;  %v1753_v13 = vor.u32 %v2119_v0, %v1752_v63  ;;  %v1637_v16 = vor.u32 %v2088_v62, %v1634_v8  ;;  %v1937_v17 = vor.u32 %v2163_v9, %v1934_v10  ;;  %v2160_v23 = vld [vmem:[#allocation8 + $0x2d4] sm:$0xf]  ;;  %v1922_v24 = vld [vmem:[#allocation8 + $0x2dc] sm:$0xf0]  ;;  %v1718_v26 = vld [vmem:[#allocation8 + $0x144] sm:$0xf0]  ;;  %v1625_v28 = vor.u32 %v2085_v18, %v1622_v22 }
  0x48   :  { %1041 = vmatpush.bf16.msrb.mxu2 %v1801_v19  ;;  %v2136_v19 = vld [vmem:[#allocation8 + $0x214] sm:$0xf]  ;;  %v1925_v29 = vor.u32 %v2160_v23, %v1922_v24  ;;  %v2082_v30 = vld [vmem:[#allocation8 + $0x64] sm:$0xf]  ;;  %v1610_v34 = vld [vmem:[#allocation8 + $0x6c] sm:$0xf0] }
  0x49   :  { %1054 = vmatpush.bf16.msrb.mxu3 %v1897_v21  ;;  %v1733_v21 = vor.u32 %v2112_v11, %v1730_v12  ;;  %v2157_v35 = vld [vmem:[#allocation8 + $0x2bc] sm:$0xf]  ;;  %v1910_v36 = vld [vmem:[#allocation8 + $0x2c4] sm:$0xf0]  ;;  %v1706_v38 = vld [vmem:[#allocation8 + $0x12c] sm:$0xf0]  ;;  %v1613_v40 = vor.u32 %v2082_v30, %v1610_v34 }
  0x4a   :  { %1016 = vmatpush.bf16.msrb.mxu0 %v1597_v20  ;;  %v1826_v20 = vld [vmem:[#allocation8 + $0x21c] sm:$0xf0]  ;;  %v1913_v41 = vor.u32 %v2157_v35, %v1910_v36  ;;  %v2079_v42 = vld [vmem:[#allocation8 + $0x4c] sm:$0xf]  ;;  %v1802_v44 = vld [vmem:[#allocation8 + $0x1ec] sm:$0xf0] }
  0x4b   :  { %1029 = vmatpush.bf16.msrb.mxu1 %v1693_v25  ;;  %v2109_v25 = vld [vmem:[#allocation8 + $0x13c] sm:$0xf]  ;;  %v1829_v27 = vor.u32 %v2136_v19, %v1826_v20  ;;  %v2154_v47 = vld [vmem:[#allocation8 + $0x2a4] sm:$0xf]  ;;  %v1898_v48 = vld [vmem:[#allocation8 + $0x2ac] sm:$0xf0] }
  0x4c   :  { %1042 = vmatpush.bf16.msrb.mxu2 %v1789_v31  ;;  %v2133_v31 = vld [vmem:[#allocation8 + $0x1fc] sm:$0xf]  ;;  %v2103_v49 = vld [vmem:[#allocation8 + $0x10c] sm:$0xf]  ;;  %v1901_v53 = vor.u32 %v2154_v47, %v1898_v48  ;;  %v2076_v55 = vld [vmem:[#allocation8 + $0x34] sm:$0xf] }
  0x4d   :  { %1055 = vmatpush.bf16.msrb.mxu3 %v1885_v33  ;;  %v1721_v33 = vor.u32 %v2109_v25, %v1718_v26  ;;  %v1586_v56 = vld [vmem:[#allocation8 + $0x3c] sm:$0xf0]  ;;  %v2100_v57 = vld [vmem:[#allocation8 + $0xf4] sm:$0xf]  ;;  %v1790_v62 = vld [vmem:[#allocation8 + $0x1d4] sm:$0xf0] }
  0x4e   :  { %1017 = vmatpush.bf16.msrb.mxu0 %v1585_v32  ;;  %v1814_v32 = vld [vmem:[#allocation8 + $0x204] sm:$0xf0]  ;;  %v1682_v58 = vld [vmem:[#allocation8 + $0xfc] sm:$0xf0]  ;;  %v2151_v63 = vld [vmem:[#allocation8 + $0x28c] sm:$0xf] }
  0x4f   :  { %1030 = vmatpush.bf16.msrb.mxu1 %v1681_v37  ;;  %v2106_v37 = vld [vmem:[#allocation8 + $0x124] sm:$0xf]  ;;  %v1817_v39 = vor.u32 %v2133_v31, %v1814_v32  ;;  %v1886_v1 = vld [vmem:[#allocation8 + $0x294] sm:$0xf0]  ;;  %v1574_v4 = vld [vmem:[#allocation8 + $0x24] sm:$0xf0] }
  0x50   :  { %1043 = vmatpush.bf16.msrb.mxu2 %v1777_v43  ;;  %v2130_v43 = vld [vmem:[#allocation8 + $0x1e4] sm:$0xf]  ;;  %v2097_v5 = vld [vmem:[#allocation8 + $0xdc] sm:$0xf]  ;;  %v2124_v9 = vld [vmem:[#allocation8 + $0x1b4] sm:$0xf] }
  0x51   :  { %1056 = vmatpush.bf16.msrb.mxu3 %v1873_v46  ;;  %v1598_v46 = vld [vmem:[#allocation8 + $0x54] sm:$0xf0]  ;;  %v1805_v51 = vor.u32 %v2130_v43, %v1802_v44  ;;  %v1778_v10 = vld [vmem:[#allocation8 + $0x1bc] sm:$0xf0]  ;;  %v2148_v11 = vld [vmem:[#allocation8 + $0x274] sm:$0xf] }
  0x52   :  { %1018 = vmatpush.bf16.msrb.mxu0 %v1573_v45  ;;  %v1709_v45 = vor.u32 %v2106_v37, %v1706_v38  ;;  %v1601_v52 = vor.u32 %v2079_v42, %v1598_v46  ;;  %v1781_v12 = vor.u32 %v2124_v9, %v1778_v10  ;;  %v2094_v18 = vld [vmem:[#allocation8 + $0xc4] sm:$0xf]  ;;  %v1658_v19 = vld [vmem:[#allocation8 + $0xcc] sm:$0xf0]  ;;  %v1766_v22 = vld [vmem:[#allocation8 + $0x1a4] sm:$0xf0] }
  0x53   :  { %1031 = vmatpush.bf16.msrb.mxu1 %v1669_v50  ;;  %v1694_v50 = vld [vmem:[#allocation8 + $0x114] sm:$0xf0]  ;;  %v1661_v20 = vor.u32 %v2094_v18, %v1658_v19  ;;  %v2145_v24 = vld [vmem:[#allocation8 + $0x25c] sm:$0xf]  ;;  %v1862_v25 = vld [vmem:[#allocation8 + $0x264] sm:$0xf0] }
  0x54   :  { %1044 = vmatpush.bf16.msrb.mxu2 %v1765_v59  ;;  %v1697_v54 = vor.u32 %v2103_v49, %v1694_v50  ;;  %v1589_v59 = vor.u32 %v2076_v55, %v1586_v56  ;;  %v1865_v26 = vor.u32 %v2145_v24, %v1862_v25  ;;  %v2142_v30 = vld [vmem:[#allocation8 + $0x244] sm:$0xf]  ;;  %v1850_v31 = vld [vmem:[#allocation8 + $0x24c] sm:$0xf0]  ;;  %v2117_v43 = vld [vmem:[#allocation8 + $0x178] sm:$0xf0] }
  0x55   :  { %1057 = vmatpush.bf16.msrb.mxu3 %v1861_v61  ;;  %v2127_v61 = vld [vmem:[#allocation8 + $0x1cc] sm:$0xf]  ;;  %v1853_v32 = vor.u32 %v2142_v30, %v1850_v31  ;;  %v1748_v42 = vld [vmem:[#allocation8 + $0x170] sm:$0xf]  ;;  %v2114_v55 = vld [vmem:[#allocation8 + $0x160] sm:$0xf0] }
  0x56   :  { %1019 = vmatpush.bf16.msrb.mxu0 %v1561_v60  ;;  %v1685_v60 = vor.u32 %v2100_v57, %v1682_v58  ;;  %v1793_v0 = vor.u32 %v2127_v61, %v1790_v62  ;;  %v1749_v50 = vor.u32 %v2117_v43, %v1748_v42  ;;  %v1844_v61 = vld [vmem:[#allocation8 + $0x230] sm:$0xf]  ;;  %v2141_v62 = vld [vmem:[#allocation8 + $0x238] sm:$0xf0]  ;;  %v2162_v19 = vld [vmem:[#allocation8 + $0x2e0] sm:$0xf0] }
  0x57   :  { %1032 = vmatpush.bf16.msrb.mxu1 %v1657_v2  ;;  %v1889_v2 = vor.u32 %v2151_v63, %v1886_v1  ;;  %v1940_v63 = vld [vmem:[#allocation8 + $0x2f0] sm:$0xf]  ;;  %v1845_v10 = vor.u32 %v2141_v62, %v1844_v61  ;;  %v2135_v30 = vld [vmem:[#allocation8 + $0x208] sm:$0xf0]  ;;  %v1676_v62 = vld [vmem:[#allocation8 + $0xe0] sm:$0xf] }
  0x58   :  { %1045 = vmatpush.bf16.msrb.mxu2 %v1753_v13  ;;  %v1874_v13 = vld [vmem:[#allocation8 + $0x27c] sm:$0xf0]  ;;  %v2075_v61 = vld [vmem:[#allocation8 + $0x28] sm:$0xf0]  ;;  %s2368_s30 = smov [#allocation11]   ;;  %s1418_s11 = sshll.u32 %s2460_s7, 4  ;;  %s1419_s11 = int_to_ptr.hbm [resolvable:$true] %s1418_s11 }
  0x59   :  { %1058 = vmatpush.bf16.msrb.mxu3 %v1849_v14  ;;  %v1877_v14 = vor.u32 %v2148_v11, %v1874_v13  ;;  %s1416_s8 = sshll.u32 %s2368_s30, 4  ;;  %s1417_s8 = int_to_ptr.vmem [resolvable:$true] %s1416_s8 }
  0x5a   :  { %1064 = vmatpush.bf16.msra.mxu0 %v1649_v3  ;;  %v2073_v3 = vld [vmem:[#allocation8 + $0x1c] sm:$0xf] }
  0x5b   :  { %1077 = vmatpush.bf16.msra.mxu1 %v1745_v7  ;;  %v1577_v6 = vor.u32 %v2073_v3, %v1574_v4  ;;  %v1670_v7 = vld [vmem:[#allocation8 + $0xe4] sm:$0xf0]  ;;  %v2165_v3 = vld [vmem:[#allocation8 + $0x2f8] sm:$0xf0]  ;;  %v1628_v4 = vld [vmem:[#allocation8 + $0x80] sm:$0xf] }
  0x5c   :  { %1090 = vmatpush.bf16.msra.mxu2 %v1841_v15  ;;  %v1673_v8 = vor.u32 %v2097_v5, %v1670_v7  ;;  %v2070_v15 = vld [vmem:[#allocation8 + $0x4] sm:$0xf]  ;;  %v2087_v5 = vld [vmem:[#allocation8 + $0x88] sm:$0xf0]  ;;  %v1724_v7 = vld [vmem:[#allocation8 + $0x140] sm:$0xf] }
  0x5d   :  { %1103 = vmatpush.bf16.msra.mxu3 %v1937_v17  ;;  %v1629_v13 = vor.u32 %v2087_v5, %v1628_v4 }
  0x5e   :  { %1065 = vmatpush.bf16.msra.mxu0 %v1637_v16  ;;  %v1562_v16 = vld [vmem:[#allocation8 + $0xc] sm:$0xf0] }
  0x5f   :  { %1078 = vmatpush.bf16.msra.mxu1 %v1733_v21  ;;  %v1565_v17 = vor.u32 %v2070_v15, %v1562_v16  ;;  %v2121_v21 = vld [vmem:[#allocation8 + $0x19c] sm:$0xf]  ;;  %v2138_v15 = vld [vmem:[#allocation8 + $0x220] sm:$0xf0]  ;;  %v1928_v16 = vld [vmem:[#allocation8 + $0x2d8] sm:$0xf] }
  0x60   :  { %1091 = vmatpush.bf16.msra.mxu2 %v1829_v27  ;;  %v1769_v23 = vor.u32 %v2121_v21, %v1766_v22  ;;  %v2118_v27 = vld [vmem:[#allocation8 + $0x184] sm:$0xf]  ;;  %v2084_v21 = vld [vmem:[#allocation8 + $0x70] sm:$0xf0]  ;;  %v1712_v22 = vld [vmem:[#allocation8 + $0x128] sm:$0xf] }
  0x61   :  { %1104 = vmatpush.bf16.msra.mxu3 %v1925_v29 }
  0x62   :  { %1066 = vmatpush.bf16.msra.mxu0 %v1625_v28  ;;  %v1754_v28 = vld [vmem:[#allocation8 + $0x18c] sm:$0xf0] }
  0x63   :  { %1079 = vmatpush.bf16.msra.mxu1 %v1721_v33  ;;  %v1757_v29 = vor.u32 %v2118_v27, %v1754_v28  ;;  %v134_v33 = vld [vmem:[#allocation7] sm:$0xf]  ;;  %v1929_v27 = vor.u32 %v2162_v19, %v1928_v16  ;;  %v2123_v16 = vld [vmem:[#allocation8 + $0x1a8] sm:$0xf0] }
  0x64   :  { %1092 = vmatpush.bf16.msra.mxu2 %v1817_v39  ;;  %v136_v34 = vperm.slane %v134_v33, 0  ;;  %v137_v35 = vperm.slane %v134_v33, 1  ;;  %v1652_v39 = vld [vmem:[#allocation8 + $0xb0] sm:$0xf]  ;;  %v138_v46 = vperm.slane %v134_v33, 2  ;;  %v139_v49 = vperm.slane %v134_v33, 3 }
  0x65   :  { %1105 = vmatpush.bf16.msra.mxu3 %v1913_v41  ;;  %v2159_v33 = vld [vmem:[#allocation8 + $0x2c8] sm:$0xf0] }
  0x66   :  { %1067 = vmatpush.bf16.msra.mxu0 %v1613_v40  ;;  %v2093_v40 = vld [vmem:[#allocation8 + $0xb8] sm:$0xf0] }
  0x67   :  { %1080 = vmatpush.bf16.msra.mxu1 %v1709_v45  ;;  %v1653_v47 = vor.u32 %v2093_v40, %v1652_v39  ;;  %v1808_v40 = vld [vmem:[#allocation8 + $0x1e8] sm:$0xf] }
  0x68   :  { %1093 = vmatpush.bf16.msra.mxu2 %v1805_v51  ;;  %v1640_v51 = vld [vmem:[#allocation8 + $0x98] sm:$0xf] }
  0x69   :  { %1106 = vmatpush.bf16.msra.mxu3 %v1901_v53 }
  0x6a   :  { %1068 = vmatpush.bf16.msra.mxu0 %v1601_v52  ;;  %v2090_v52 = vld [vmem:[#allocation8 + $0xa0] sm:$0xf0] }
  0x6b   :  { %1081 = vmatpush.bf16.msra.mxu1 %v1697_v54  ;;  %v1736_v54 = vld [vmem:[#allocation8 + $0x158] sm:$0xf] }
  0x6c   :  { %1094 = vmatpush.bf16.msra.mxu2 %v1793_v0 }
  0x6d   :  { %1107 = vmatpush.bf16.msra.mxu3 %v1889_v2  ;;  %v1737_v2 = vor.u32 %v2114_v55, %v1736_v54  ;;  %v1796_v54 = vld [vmem:[#allocation8 + $0x1d0] sm:$0xf]  ;;  %v2129_v55 = vld [vmem:[#allocation8 + $0x1d8] sm:$0xf0] }
  0x6e   :  { %1069 = vmatpush.bf16.msra.mxu0 %v1589_v59 }
  0x6f   :  { %1082 = vmatpush.bf16.msra.mxu1 %v1685_v60  ;;  %v1641_v60 = vor.u32 %v2090_v52, %v1640_v51 }
  0x70   :  { %1095 = vmatpush.bf16.msra.mxu2 %v1781_v12  ;;  %v1941_v12 = vor.u32 %v2165_v3, %v1940_v63  ;;  %v2099_v63 = vld [vmem:[#allocation8 + $0xe8] sm:$0xf0]  ;;  %v2126_v3 = vld [vmem:[#allocation8 + $0x1c0] sm:$0xf0] }
  0x71   :  { %1108 = vmatpush.bf16.msra.mxu3 %v1877_v14  ;;  %v1832_v14 = vld [vmem:[#allocation8 + $0x218] sm:$0xf]  ;;  %v1677_v5 = vor.u32 %v2099_v63, %v1676_v62 }
  0x72   :  { %1070 = vmatpush.bf16.msra.mxu0 %v1577_v6  ;;  %v1833_v25 = vor.u32 %v2138_v15, %v1832_v14  ;;  %v1772_v15 = vld [vmem:[#allocation8 + $0x1a0] sm:$0xf] }
  0x73   :  { %1083 = vmatpush.bf16.msra.mxu1 %v1673_v8  ;;  %v2111_v8 = vld [vmem:[#allocation8 + $0x148] sm:$0xf0] }
  0x74   :  { %1096 = vmatpush.bf16.msra.mxu2 %v1769_v23  ;;  %v1725_v18 = vor.u32 %v2111_v8, %v1724_v7  ;;  %v2108_v23 = vld [vmem:[#allocation8 + $0x130] sm:$0xf0]  ;;  %v2150_v7 = vld [vmem:[#allocation8 + $0x280] sm:$0xf0]  ;;  %v1568_v8 = vld [vmem:[#allocation8 + $0x8] sm:$0xf] }
  0x75   :  { %1109 = vmatpush.bf16.msra.mxu3 %v1865_v26  ;;  %v1713_v31 = vor.u32 %v2108_v23, %v1712_v22  ;;  %v2173_v22 = vld [vmem:[#allocation10 + $0x38] sm:$0xff]  ;;  %v1773_v23 = vor.u32 %v2123_v16, %v1772_v15 }
  0x76   :  { %1071 = vmatpush.bf16.msra.mxu0 %v1565_v17 }
  0x77   :  { %1084 = vmatpush.bf16.msra.mxu1 %v1661_v20  ;;  %v1616_v20 = vld [vmem:[#allocation8 + $0x68] sm:$0xf] }
  0x78   :  { %1097 = vmatpush.bf16.msra.mxu2 %v1757_v29  ;;  %v1617_v28 = vor.u32 %v2084_v21, %v1616_v20  ;;  %v1820_v29 = vld [vmem:[#allocation8 + $0x200] sm:$0xf]  ;;  %v2147_v21 = vld [vmem:[#allocation8 + $0x268] sm:$0xf0] }
  0x79   :  { %1110 = vmatpush.bf16.msra.mxu3 %v1853_v32  ;;  %v1916_v32 = vld [vmem:[#allocation8 + $0x2c0] sm:$0xf] }
  0x7a   :  { %v1917_v39 = vor.u32 %v2159_v33, %v1916_v32  ;;  %v1868_v20 = vld [vmem:[#allocation8 + $0x260] sm:$0xf]  ;;  %v2171_v32 = vld [vmem:[#allocation10 + $0x28] sm:$0xff] }
  0x7b   :  { %v2170_v33 = vld [vmem:[#allocation10 + $0x20] sm:$0xff] }
  0xb6   :  { %v313_v36 = vpop.f32.mrf.mxu0 }
  0xb7   :  { %v314_v37 = vadd.f32 %v313_v36, %v136_v34  ;;  %v326_v38 = vpop.f32.mrf.mxu1  ;;  %v1604_v34 = vld [vmem:[#allocation8 + $0x50] sm:$0xf] }
  0xb8   :  { %v327_v41 = vadd.f32 %v326_v38, %v137_v35  ;;  %v2081_v35 = vld [vmem:[#allocation8 + $0x58] sm:$0xf0]  ;;  %v1700_v36 = vld [vmem:[#allocation8 + $0x110] sm:$0xf]  ;;  %v1821_v38 = vor.u32 %v2135_v30, %v1820_v29 }
  0xb9   :  { %v356_v44 = vmax.f32 %v314_v37, 0.0  ;;  %v2105_v37 = vld [vmem:[#allocation8 + $0x118] sm:$0xf0]  ;;  %v1605_v42 = vor.u32 %v2081_v35, %v1604_v34  ;;  %v2172_v29 = vld [vmem:[#allocation10 + $0x30] sm:$0xff] }
  0xba   :  { %v357_v45 = vmax.f32 %v327_v41, 0.0  ;;  %v2132_v41 = vld [vmem:[#allocation8 + $0x1f0] sm:$0xf0]  ;;  %v1701_v43 = vor.u32 %v2105_v37, %v1700_v36  ;;  %v2181_v34 = vld [vmem:[#allocation10 + $0x78] sm:$0xff]  ;;  %v2179_v37 = vld [vmem:[#allocation10 + $0x68] sm:$0xff] }
  0xbb   :  { %v2424_v48 = vpack.c.bf16 %v356_v44, %v356_v44  ;;  %v1904_v44 = vld [vmem:[#allocation8 + $0x2a8] sm:$0xf]  ;;  %v1809_v51 = vor.u32 %v2132_v41, %v1808_v40  ;;  %v2169_v35 = vld [vmem:[#allocation10 + $0x18] sm:$0xff]  ;;  %v2168_v36 = vld [vmem:[#allocation10 + $0x10] sm:$0xff] }
  0xbc   :  { %v2426_v53 = vpack.c.bf16 %v357_v45, %v357_v45  ;;  %v2156_v45 = vld [vmem:[#allocation8 + $0x2b0] sm:$0xf0] }
  0xbd   :  { %1020 = vmatmul.bf16.vlgmr.msrb.gmra.mxu0 %v2424_v48  ;;  %v1905_v52 = vor.u32 %v2156_v45, %v1904_v44  ;;  %v2176_v40 = vld [vmem:[#allocation10 + $0x50] sm:$0xff]  ;;  %v492_v44 = vld [vmem:[%s2457_s4] sm:$0x7] }
  0xbe   :  { %v339_v56 = vpop.f32.mrf.mxu2  ;;  %1033 = vmatmul.bf16.vlgmr.msrb.gmra.mxu1 %v2426_v53  ;;  %v315_v59 = vpop.f32.mrf.mxu0  ;;  %1116 = vmatpush.bf16.msrb.mxu0 %v1653_v47  ;;  %v2078_v47 = vld [vmem:[#allocation8 + $0x40] sm:$0xf0]  ;;  %v2188_v41 = vld [vmem:[#allocation10 + $0xb0] sm:$0xff] }
  0xbf   :  { %v340_v57 = vadd.f32 %v339_v56, %v138_v46  ;;  %v352_v58 = vpop.f32.mrf.mxu3  ;;  %1129 = vmatpush.bf16.msrb.mxu1 %v1749_v50  ;;  %v328_v1 = vpop.f32.mrf.mxu1  ;;  %v1592_v46 = vld [vmem:[#allocation8 + $0x38] sm:$0xf]  ;;  %v2102_v50 = vld [vmem:[#allocation8 + $0x100] sm:$0xf0]  ;;  %v2153_v59 = vld [vmem:[#allocation8 + $0x298] sm:$0xf0] }
  0xc0   :  { %v353_v0 = vadd.f32 %v352_v58, %v139_v49  ;;  %v1688_v49 = vld [vmem:[#allocation8 + $0xf8] sm:$0xf]  ;;  %v1593_v56 = vor.u32 %v2078_v47, %v1592_v46  ;;  %v1892_v58 = vld [vmem:[#allocation8 + $0x290] sm:$0xf]  ;;  %v494_v47 = vperm.slane %v492_v44, 0 }
  0xc1   :  { %v358_v6 = vmax.f32 %v340_v57, 0.0  ;;  %v1689_v57 = vor.u32 %v2102_v50, %v1688_v49  ;;  %v1893_v1 = vor.u32 %v2153_v59, %v1892_v58  ;;  %v2174_v49 = vld [vmem:[#allocation10 + $0x40] sm:$0xff] }
  0xc2   :  { %v359_v9 = vmax.f32 %v353_v0, 0.0  ;;  %1117 = vmatpush.bf16.msrb.mxu0 %v1641_v60  ;;  %v1580_v60 = vld [vmem:[#allocation8 + $0x20] sm:$0xf]  ;;  %v1797_v0 = vor.u32 %v2129_v55, %v1796_v54 }
  0xc3   :  { %v2430_v11 = vpack.c.bf16 %v358_v6, %v358_v6  ;;  %1130 = vmatpush.bf16.msrb.mxu1 %v1737_v2  ;;  %v1784_v2 = vld [vmem:[#allocation8 + $0x1b8] sm:$0xf]  ;;  %v1581_v4 = vor.u32 %v2075_v61, %v1580_v60  ;;  %v2186_v50 = vld [vmem:[#allocation10 + $0xa0] sm:$0xff]  ;;  %v2183_v61 = vld [vmem:[#allocation10 + $0x88] sm:$0xff] }
  0xc4   :  { %v2432_v17 = vpack.c.bf16 %v359_v9, %v359_v9  ;;  %v1880_v6 = vld [vmem:[#allocation8 + $0x278] sm:$0xf]  ;;  %v2072_v9 = vld [vmem:[#allocation8 + $0x10] sm:$0xf0] }
  0xc5   :  { %1046 = vmatmul.bf16.vlgmr.msrb.gmra.mxu2 %v2430_v11  ;;  %v1881_v14 = vor.u32 %v2150_v7, %v1880_v6 }
  0xc6   :  { %1059 = vmatmul.bf16.vlgmr.msrb.gmra.mxu3 %v2432_v17  ;;  %v341_v24 = vpop.f32.mrf.mxu2  ;;  %1142 = vmatpush.bf16.msrb.mxu2 %v1845_v10  ;;  %v1664_v10 = vld [vmem:[#allocation8 + $0xc8] sm:$0xf] }
  0xc7   :  { %v354_v26 = vpop.f32.mrf.mxu3  ;;  %1155 = vmatpush.bf16.msrb.mxu3 %v1941_v12  ;;  %1118 = vmatpush.bf16.msrb.mxu0 %v1629_v13  ;;  %v2096_v12 = vld [vmem:[#allocation8 + $0xd0] sm:$0xf0]  ;;  %v1785_v13 = vor.u32 %v2126_v3, %v1784_v2  ;;  %v1869_v24 = vor.u32 %v2147_v21, %v1868_v20  ;;  %v2182_v2 = vld [vmem:[#allocation10 + $0x80] sm:$0xff]  ;;  %v496_v21 = vperm.slane %v492_v44, 2 }
  0xc8   :  { %1131 = vmatpush.bf16.msrb.mxu1 %v1725_v18  ;;  %v1569_v18 = vor.u32 %v2072_v9, %v1568_v8  ;;  %v1665_v19 = vor.u32 %v2096_v12, %v1664_v10  ;;  %v2120_v26 = vld [vmem:[#allocation8 + $0x190] sm:$0xf0] }
  0xca   :  { %1143 = vmatpush.bf16.msrb.mxu2 %v1833_v25  ;;  %v1760_v25 = vld [vmem:[#allocation8 + $0x188] sm:$0xf] }
  0xcb   :  { %1156 = vmatpush.bf16.msrb.mxu3 %v1929_v27  ;;  %1119 = vmatpush.bf16.msrb.mxu0 %v1617_v28  ;;  %v1856_v27 = vld [vmem:[#allocation8 + $0x248] sm:$0xf]  ;;  %v2144_v28 = vld [vmem:[#allocation8 + $0x250] sm:$0xf0]  ;;  %v1761_v30 = vor.u32 %v2120_v26, %v1760_v25 }
  0xcc   :  { %1132 = vmatpush.bf16.msrb.mxu1 %v1713_v31  ;;  %v1857_v31 = vor.u32 %v2144_v28, %v1856_v27 }
  0xcd   :  { %1072 = vmatmul.bf16.vlgmr.msra.gmra.mxu0 %v2424_v48 }
  0xce   :  { %1144 = vmatpush.bf16.msrb.mxu2 %v1821_v38  ;;  %1085 = vmatmul.bf16.vlgmr.msra.gmra.mxu1 %v2426_v53  ;;  %v2166_v38 = vld [vmem:[#allocation10] sm:$0xff] }
  0xcf   :  { %1157 = vmatpush.bf16.msrb.mxu3 %v1917_v39  ;;  %1120 = vmatpush.bf16.msrb.mxu0 %v1605_v42  ;;  %v2178_v39 = vld [vmem:[#allocation10 + $0x60] sm:$0xff]  ;;  %v2175_v42 = vld [vmem:[#allocation10 + $0x48] sm:$0xff] }
  0xd0   :  { %1133 = vmatpush.bf16.msrb.mxu1 %v1701_v43  ;;  %v2187_v43 = vld [vmem:[#allocation10 + $0xa8] sm:$0xff] }
  0xd2   :  { %1145 = vmatpush.bf16.msrb.mxu2 %v1809_v51 }
  0xd3   :  { %1158 = vmatpush.bf16.msrb.mxu3 %v1905_v52  ;;  %1121 = vmatpush.bf16.msrb.mxu0 %v1593_v56  ;;  %v2185_v52 = vld [vmem:[#allocation10 + $0x98] sm:$0xff] }
  0xd4   :  { %1134 = vmatpush.bf16.msrb.mxu1 %v1689_v57  ;;  %v2184_v57 = vld [vmem:[#allocation10 + $0x90] sm:$0xff] }
  0xd5   :  { %1098 = vmatmul.bf16.vlgmr.msra.gmra.mxu2 %v2430_v11 }
  0xd6   :  { %1111 = vmatmul.bf16.vlgmr.msra.gmra.mxu3 %v2432_v17  ;;  %1146 = vmatpush.bf16.msrb.mxu2 %v1797_v0 }
  0xd7   :  { %1159 = vmatpush.bf16.msrb.mxu3 %v1893_v1  ;;  %1122 = vmatpush.bf16.msrb.mxu0 %v1581_v4  ;;  %v495_v4 = vperm.slane %v492_v44, 1 }
  0xd8   :  { %1135 = vmatpush.bf16.msrb.mxu1 %v1677_v5 }
  0xda   :  { %1147 = vmatpush.bf16.msrb.mxu2 %v1785_v13 }
  0xdb   :  { %1160 = vmatpush.bf16.msrb.mxu3 %v1881_v14  ;;  %1123 = vmatpush.bf16.msrb.mxu0 %v1569_v18 }
  0xdc   :  { %1136 = vmatpush.bf16.msrb.mxu1 %v1665_v19 }
  0xde   :  { %1148 = vmatpush.bf16.msrb.mxu2 %v1773_v23  ;;  %1124 = vmatmul.bf16.vlgmr.msrb.gmra.mxu0 %v2424_v48  ;;  %v2180_v48 = vld [vmem:[#allocation10 + $0x70] sm:$0xff] }
  0xdf   :  { %1370 = vmatpush.bf16.msra.mxu0 %v2173_v22  ;;  %1161 = vmatpush.bf16.msrb.mxu3 %v1869_v24 }
  0xe0   :  { %1137 = vmatmul.bf16.vlgmr.msrb.gmra.mxu1 %v2426_v53  ;;  %v2167_v53 = vld [vmem:[#allocation10 + $0x8] sm:$0xff] }
  0xe1   :  { %1383 = vmatpush.bf16.msra.mxu1 %v2181_v34 }
  0xe2   :  { %1149 = vmatpush.bf16.msrb.mxu2 %v1761_v30 }
  0xe3   :  { %1371 = vmatpush.bf16.msra.mxu0 %v2172_v29  ;;  %1162 = vmatpush.bf16.msrb.mxu3 %v1857_v31 }
  0xe5   :  { %1150 = vmatmul.bf16.vlgmr.msrb.gmra.mxu2 %v2430_v11  ;;  %1384 = vmatpush.bf16.msra.mxu1 %v2180_v48  ;;  %v2177_v11 = vld [vmem:[#allocation10 + $0x58] sm:$0xff] }
  0xe6   :  { %1163 = vmatmul.bf16.vlgmr.msrb.gmra.mxu3 %v2432_v17  ;;  %v2189_v17 = vld [vmem:[#allocation10 + $0xb8] sm:$0xff] }
  0xe7   :  { %1372 = vmatpush.bf16.msra.mxu0 %v2171_v32  ;;  %1396 = vmatpush.bf16.msra.mxu2 %v2189_v17 }
  0xe9   :  { %1385 = vmatpush.bf16.msra.mxu1 %v2179_v37 }
  0xeb   :  { %1373 = vmatpush.bf16.msra.mxu0 %v2170_v33  ;;  %1397 = vmatpush.bf16.msra.mxu2 %v2188_v41 }
  0xed   :  { %1386 = vmatpush.bf16.msra.mxu1 %v2178_v39 }
  0xef   :  { %1374 = vmatpush.bf16.msra.mxu0 %v2169_v35  ;;  %1398 = vmatpush.bf16.msra.mxu2 %v2187_v43 }
  0xf1   :  { %1387 = vmatpush.bf16.msra.mxu1 %v2177_v11 }
  0xf3   :  { %1375 = vmatpush.bf16.msra.mxu0 %v2168_v36  ;;  %1399 = vmatpush.bf16.msra.mxu2 %v2186_v50 }
  0xf5   :  { %1388 = vmatpush.bf16.msra.mxu1 %v2176_v40 }
  0xf7   :  { %1376 = vmatpush.bf16.msra.mxu0 %v2167_v53  ;;  %1400 = vmatpush.bf16.msra.mxu2 %v2185_v52 }
  0xf9   :  { %1389 = vmatpush.bf16.msra.mxu1 %v2175_v42 }
  0xfb   :  { %1377 = vmatpush.bf16.msra.mxu0 %v2166_v38  ;;  %1401 = vmatpush.bf16.msra.mxu2 %v2184_v57  ;;  %v2202_v38 = vld [vmem:[%s2459_s6] ss:$0 sm:$0xff] }
  0xfd   :  { %1390 = vmatpush.bf16.msra.mxu1 %v2174_v49 }
  0xff   :  { %1402 = vmatpush.bf16.msra.mxu2 %v2183_v61 }
 0x103   :  { %1403 = vmatpush.bf16.msra.mxu2 %v2182_v2 }
 0x13a   :  { %v1021_v45 = vpop.f32.mrf.mxu0 }
 0x13b   :  { %v1034_v46 = vpop.f32.mrf.mxu1  ;;  %v1022_v51 = vadd.f32 %v1021_v45, %v494_v47 }
 0x13d   :  { %v1035_v56 = vadd.f32 %v1034_v46, %v1022_v51 }
 0x142   :  { %v1023_v54 = vpop.f32.mrf.mxu0 }
 0x143   :  { %v1036_v55 = vpop.f32.mrf.mxu1 }
 0x148   :  { %v1047_v58 = vpop.f32.mrf.mxu2 }
 0x149   :  { %v1048_v59 = vadd.f32 %v1047_v58, %v1035_v56  ;;  %v1060_v60 = vpop.f32.mrf.mxu3 }
 0x14a   :  { %v1073_v63 = vpop.f32.mrf.mxu0 }
 0x14b   :  { %v1061_v62 = vadd.f32 %v1060_v60, %v1048_v59  ;;  %v1086_v0 = vpop.f32.mrf.mxu1  ;;  %v1074_v7 = vadd.f32 %v1073_v63, %v495_v4 }
 0x14d   :  { %v1168_v1 = vmax.f32 %v1061_v62, 0.0  ;;  %v1087_v10 = vadd.f32 %v1086_v0, %v1074_v7 }
 0x14f   :  { %v1171_v3 = vpack.c.bf16 %v1168_v1, %v1168_v1 }
 0x150   :  { %v1049_v5 = vpop.f32.mrf.mxu2 }
 0x151   :  { %v1062_v6 = vpop.f32.mrf.mxu3  ;;  %1378 = vmatmul.bf16.vlgmr.msra.gmra.mxu0 %v1171_v3 }
 0x152   :  { %v1075_v8 = vpop.f32.mrf.mxu0 }
 0x153   :  { %v1088_v9 = vpop.f32.mrf.mxu1 }
 0x158   :  { %v1099_v12 = vpop.f32.mrf.mxu2 }
 0x159   :  { %v1100_v13 = vadd.f32 %v1099_v12, %v1087_v10  ;;  %v1112_v14 = vpop.f32.mrf.mxu3 }
 0x15b   :  { %v1113_v15 = vadd.f32 %v1112_v14, %v1100_v13  ;;  %v1125_v16 = vpop.f32.mrf.mxu0 }
 0x15c   :  { %v1126_v24 = vadd.f32 %v1125_v16, %v496_v21 }
 0x15d   :  { %v1169_v18 = vmax.f32 %v1113_v15, 0.0  ;;  %v1138_v19 = vpop.f32.mrf.mxu1 }
 0x15e   :  { %v1139_v27 = vadd.f32 %v1138_v19, %v1126_v24 }
 0x15f   :  { %v1172_v20 = vpack.c.bf16 %v1169_v18, %v1169_v18 }
 0x160   :  { %v1101_v22 = vpop.f32.mrf.mxu2 }
 0x161   :  { %v1114_v23 = vpop.f32.mrf.mxu3  ;;  %1391 = vmatmul.bf16.vlgmr.msra.gmra.mxu1 %v1172_v20 }
 0x163   :  { %v1127_v25 = vpop.f32.mrf.mxu0 }
 0x165   :  { %v1140_v26 = vpop.f32.mrf.mxu1 }
 0x168   :  { %v1151_v28 = vpop.f32.mrf.mxu2 }
 0x169   :  { %v1152_v29 = vadd.f32 %v1151_v28, %v1139_v27  ;;  %v1164_v30 = vpop.f32.mrf.mxu3 }
 0x16b   :  { %v1165_v31 = vadd.f32 %v1164_v30, %v1152_v29 }
 0x16d   :  { %v1170_v32 = vmax.f32 %v1165_v31, 0.0 }
 0x16f   :  { %v1173_v33 = vpack.c.bf16 %v1170_v32, %v1170_v32 }
 0x170   :  { %v1153_v34 = vpop.f32.mrf.mxu2 }
 0x171   :  { %v1166_v35 = vpop.f32.mrf.mxu3  ;;  %1404 = vmatmul.bf16.vlgmr.msra.gmra.mxu2 %v1173_v33 }
 0x1ce   :  { %v1379_v36 = vpop.f32.mrf.mxu0 }
 0x1cf   :  { %v1380_v39 = vadd.f32 %v2202_v38, %v1379_v36 }
 0x1d6   :  { %v1381_v48 = vpop.f32.mrf.mxu0 }
 0x1de   :  { %v1392_v53 = vpop.f32.mrf.mxu1 }
 0x1df   :  { %v1393_v11 = vadd.f32 %v1392_v53, %v1380_v39 }
 0x1e6   :  { %v1394_v37 = vpop.f32.mrf.mxu1 }
 0x1f4   :  { %v1405_v17 = vpop.f32.mrf.mxu2 }
 0x1f5   :  { %v1406_v40 = vadd.f32 %v1405_v17, %v1393_v11 }
 0x1f7   :  { %2203 = vtanh.f32 %v1406_v40 }
 0x1fc   :  { %v1407_v41 = vpop.f32.mrf.mxu2 }
 0x1fd   :  { %v2204_v42 = vpop.eup %2203 }
 0x1fe   :  { %1410 = vst [vmem:[#allocation11] sm:$0xff] %v2204_v42 }
 0x1ff   :  { %1421 = dma.vmem_to_hbm [thread:$0]  %s1417_s8, 128, %s1419_s11, [#allocation4]  }
 0x200   :  { %2355 = dma.done.wait [#allocation4], 128  }
 0x201   :  { %2356 = vsyncadd [#allocation4], 4294967168 }
 0x202   :  { %1426 = vsyncpa [#allocation3], 1 }
 0x203   :  { %1427 = vsyncpa [#allocation6], 1 }
 0x204   :  { %1428 = vsyncpa [#allocation9], 1 }
 0x205   :  { %1429 = vsyncpa [#allocation4], 1 }

</bundles_post_ra>
